<compile_context>
chip_gen: v6e
topology: v6e:2x2x1
jax: 0.10.0
libtpu: 0.0.40
codegen_flags: <defaults>
</compile_context>

<pallas_src>
import jax
import jax.numpy as jnp
from jax.experimental import pallas as pl
from jax.experimental.pallas import tpu as pltpu


def attn_pred_kernel(h_ref, w_ref, out_ref):
    h = h_ref[...]                    # (bt, F*D)   lane-dense activations
    w = w_ref[...]                    # (F*D, 2F)   [block-diag W1 | W2], VMEM-resident

    # One fused MXU matmul: cols [0:F) -> score, cols [F:2F) -> pre-sigmoid weight.
    proj = jnp.dot(h, w, preferred_element_type=jnp.float32)   # (bt, 2F) f32
    nf = proj.shape[1] // 2
    score = proj[:, :nf]
    weight = jax.nn.sigmoid(proj[:, nf:])

    logit = jnp.sum(weight * score, axis=1)                    # (bt,)
    out_ref[...] = logit.reshape(out_ref.shape).astype(out_ref.dtype)


def prepare_weights(w1, w2):
    """Build the fused projection weight once (hoist out of the per-call path).

    w1: (D, 1)    == mlp1.weight.T
    w2: (F*D, F)  == mlp2[0].weight.T
    returns (F*D, 2F) = [block_diag(w1) | w2]
    """
    num_fields = w2.shape[1]
    w1_bd = jnp.kron(jnp.eye(num_fields, dtype=w1.dtype), w1)   # (F*D, F)
    return jnp.concatenate([w1_bd, w2], axis=1)                  # (F*D, 2F)


def attentional_prediction(h, w1=None, w2=None, *, w_cat=None, compute_dtype=None):
    """h: (B, F, D); w1: (D, 1); w2: (F*D, F) -> logit (B, 1).

    Pass a precomputed `w_cat = prepare_weights(w1, w2)` to skip per-call weight prep.
    `compute_dtype=jnp.bfloat16` optionally halves HBM bytes for the dominant h stream
    (post-matmul math stays f32); validate with a looser tolerance if enabled.
    """
    B, F, D = h.shape
    FD = F * D
    if w_cat is None:
        w_cat = prepare_weights(w1, w2)
    if compute_dtype is not None:
        h = h.astype(compute_dtype)
        w_cat = w_cat.astype(compute_dtype)

    h_flat = h.reshape(B, FD)                 # row-major == torch flatten(1); free HBM view
    itemsize = jnp.dtype(h_flat.dtype).itemsize

    # ---- generation-aware VMEM budget (v7x: 64 MiB physical; v5e/v6e: 128 MiB) ----
    try:
        vmem_physical = int(pltpu.get_tpu_info().vmem_capacity_bytes)
    except Exception:
        vmem_physical = 64 * 1024 * 1024      # conservative fallback = v7x per-TC VMEM
    vmem_limit = int(min(96 * 1024 * 1024,
                         max(48 * 1024 * 1024, (vmem_physical * 3) // 4)))
    vmem_budget = (vmem_limit * 3) // 4       # what we allow our buffers to use

    # ---- adaptive batch-tile selection -------------------------------------------
    align = 128 if B >= 128 else 8            # lane-dense output stores when possible
    lane_2f = max(128, ((2 * F + 127) // 128) * 128)

    def vmem_use(bt):
        h_buf = 2 * bt * FD * itemsize        # double-buffered activation tiles
        inter = 3 * bt * lane_2f * 4          # proj / score / weight intermediates (f32)
        w_buf = 2 * FD * 2 * F * itemsize     # resident fused weight (double-buffered)
        o_buf = 2 * max(128, bt) * 4          # output tile
        return h_buf + inter + w_buf + o_buf

    # Target ~8 MiB per pipelined h buffer (~16 MiB double-buffered): measured sweet
    # spot for HBM roofline on mem-bound kernels.
    bt = max(align, ((8 * 1024 * 1024) // (FD * itemsize)) // align * align)
    bt = min(bt, max(align, (B // align) * align))          # don't exceed the batch
    # Keep >= 2 grid blocks when the batch allows, so v7x's two TensorCores both work.
    if B >= 2 * align and B // bt < 2:
        bt = max(align, (pl.cdiv(B, 2) // align) * align)
    # Shrink if the VMEM estimate would overflow the generation budget (huge F*D).
    while bt > align and vmem_use(bt) > vmem_budget:
        bt = max(align, ((bt // 2) // align) * align)

    n_blocks = B // bt
    b_main = n_blocks * bt
    b_rem = B - b_main

    outs = []
    if n_blocks > 0:
        out_main = pl.pallas_call(
            attn_pred_kernel,
            out_shape=jax.ShapeDtypeStruct((n_blocks, 1, bt), jnp.float32),
            grid=(n_blocks,),
            in_specs=[
                # Grid only touches blocks fully inside [0, b_main): no pad copy needed.
                pl.BlockSpec((bt, FD), lambda i: (i, 0)),        # batch-tiled activations
                pl.BlockSpec((FD, 2 * F), lambda i: (0, 0)),     # weights stay resident
            ],
            out_specs=pl.BlockSpec((1, 1, bt), lambda i: (i, 0, 0)),  # lane-dense output
            compiler_params=pltpu.CompilerParams(
                dimension_semantics=("parallel",),
                vmem_limit_bytes=vmem_limit,
            ),
            cost_estimate=pl.CostEstimate(
                flops=2 * b_main * FD * 2 * F + 3 * b_main * F,
                transcendentals=b_main * F,
                bytes_accessed=b_main * FD * itemsize + FD * 2 * F * itemsize + b_main * 4,
            ),
        )(h_flat, w_cat)
        outs.append(out_main.reshape(b_main, 1))

    if b_rem > 0:
        # Tiny plain-JAX epilogue for the ragged tail (< bt rows) — avoids a full-array
        # HBM pad copy of the activations, which would ~triple traffic on a mem-bound op.
        proj = jnp.dot(h_flat[b_main:].astype(jnp.float32), w_cat.astype(jnp.float32))
        score = proj[:, :F]
        weight = jax.nn.sigmoid(proj[:, F:])
        outs.append(jnp.sum(weight * score, axis=1, keepdims=True))

    return outs[0] if len(outs) == 1 else jnp.concatenate(outs, axis=0)


def reference(h, w1, w2):
    B, F, D = h.shape
    score = jnp.einsum("bfd,do->bf", h, w1)
    weight = jax.nn.sigmoid(h.reshape(B, F * D) @ w2)
    return jnp.sum(weight * score, axis=1, keepdims=True)


if __name__ == "__main__":
    key = jax.random.PRNGKey(0)
    k_h, k_w1, k_w2, k_h2 = jax.random.split(key, 4)

    F, D = 8, 32                                  # num_fields, embedding_dim
    b1 = 1.0 / (D ** 0.5)
    b2 = 1.0 / ((F * D) ** 0.5)
    # Deterministic init mimicking nn.Linear's U(-1/sqrt(fan_in), 1/sqrt(fan_in)).
    w1 = jax.random.uniform(k_w1, (D, 1), minval=-b1, maxval=b1, dtype=jnp.float32)
    w2 = jax.random.uniform(k_w2, (F * D, F), minval=-b2, maxval=b2, dtype=jnp.float32)
    w_cat = prepare_weights(w1, w2)               # hoisted weight prep (built once)

    # Case 1: multi-block grid + ragged-tail epilogue (exercises the main kernel path).
    B = 300
    h = jax.random.normal(k_h, (B, F, D), dtype=jnp.float32)
    out = attentional_prediction(h, w_cat=w_cat)
    out = jax.block_until_ready(out)
    ref = reference(h, w1, w2)
    assert out.shape == (B, 1), out.shape
    assert jnp.allclose(out, ref, atol=1e-4, rtol=1e-4)

    # Case 2: tiny batch, single-block grid.
    B2 = 8
    h2 = jax.random.normal(k_h2, (B2, F, D), dtype=jnp.float32)
    out2 = jax.block_until_ready(attentional_prediction(h2, w1, w2))
    assert out2.shape == (B2, 1), out2.shape
    assert jnp.allclose(out2, reference(h2, w1, w2), atol=1e-4, rtol=1e-4)

    print("KERNEL_OK")
</pallas_src>

<mosaic_0001>
module attributes {stable_mosaic.version = 11 : i64} {
  func.func @attn_pred_kernel(%arg0: i32, %arg1: memref<128x256xf32, #tpu.memory_space<vmem>>, %arg2: memref<256x16xf32, #tpu.memory_space<vmem>>, %arg3: memref<1x1x128xf32, #tpu.memory_space<vmem>>) attributes {dimension_semantics = [#tpu.dimension_semantics<parallel>], iteration_bounds = array<i64: 2>, scalar_prefetch = 0 : i64, scratch_operands = 0 : i64, tpu.core_type = #tpu.core_type<tc>, window_params = [{transform_indices = @transform_0, window_bounds = array<i64: 128, 256>}, {pipeline_mode = #tpu.pipeline_mode<synchronous>, transform_indices = @transform_1, window_bounds = array<i64: 256, 16>}, {transform_indices = @transform_2, window_bounds = array<i64: 1, 1, 128>}]} {
    %c0 = arith.constant 0 : index
    %c0_0 = arith.constant 0 : index
    %0 = vector.load %arg1[%c0, %c0_0] : memref<128x256xf32, #tpu.memory_space<vmem>>, vector<128x256xf32>
    %c0_1 = arith.constant 0 : index
    %c0_2 = arith.constant 0 : index
    %1 = vector.load %arg2[%c0_1, %c0_2] : memref<256x16xf32, #tpu.memory_space<vmem>>, vector<256x16xf32>
    %cst = arith.constant dense<0.000000e+00> : vector<128x16xf32>
    %2 = tpu.matmul %0, %1, %cst {dimension_numbers = #tpu.dot_dimension_numbers<[1], [0], [0], [1], [0, 0, 1, 1], [], []>} : vector<128x256xf32>, vector<256x16xf32>, vector<128x16xf32> -> vector<128x16xf32>
    %3 = vector.extract_strided_slice %2 {offsets = [0, 0], sizes = [128, 8], strides = [1, 1]} : vector<128x16xf32> to vector<128x8xf32>
    %4 = vector.extract_strided_slice %2 {offsets = [0, 8], sizes = [128, 8], strides = [1, 1]} : vector<128x16xf32> to vector<128x8xf32>
    %5 = arith.negf %4 : vector<128x8xf32>
    %6 = math.exp %5 : vector<128x8xf32>
    %cst_3 = arith.constant 1.000000e+00 : f32
    %7 = vector.broadcast %cst_3 : f32 to vector<128x8xf32>
    %8 = arith.addf %7, %6 : vector<128x8xf32>
    %9 = arith.divf %7, %8 : vector<128x8xf32>
    %10 = arith.mulf %9, %3 : vector<128x8xf32>
    %cst_4 = arith.constant dense<0.000000e+00> : vector<128xf32>
    %11 = vector.multi_reduction <add>, %10, %cst_4 [1] : vector<128x8xf32> to vector<128xf32>
    %12 = vector.shape_cast %11 : vector<128xf32> to vector<1x1x128xf32>
    %c0_5 = arith.constant 0 : index
    %c0_6 = arith.constant 0 : index
    %c0_7 = arith.constant 0 : index
    %13 = vector.load %arg3[%c0_5, %c0_6, %c0_7] : memref<1x1x128xf32, #tpu.memory_space<vmem>>, vector<1x1x128xf32>
    tpu.vector_store %arg3[%c0_5, %c0_6, %c0_7], %12 {strides = array<i32>} : memref<1x1x128xf32, #tpu.memory_space<vmem>>, vector<1x1x128xf32>,
    return
  }
  func.func @transform_0(%arg0: i32) -> (i32, i32) {
    %c0_i32 = arith.constant 0 : i32
    %c0_i32_0 = arith.constant 0 : i32
    return %arg0, %c0_i32 : i32, i32
  }
  func.func @transform_1(%arg0: i32) -> (i32, i32) {
    %c0_i32 = arith.constant 0 : i32
    %c0_i32_0 = arith.constant 0 : i32
    %c0_i32_1 = arith.constant 0 : i32
    return %c0_i32, %c0_i32_0 : i32, i32
  }
  func.func @transform_2(%arg0: i32) -> (i32, i32, i32) {
    %c0_i32 = arith.constant 0 : i32
    %c0_i32_0 = arith.constant 0 : i32
    %c0_i32_1 = arith.constant 0 : i32
    return %arg0, %c0_i32, %c0_i32_0 : i32, i32, i32
  }
}

</mosaic_0001>

<bundles_post_ra>
// kernel: tpu_custom_call.1
= control target key start
LH: loop header
LB: loop body
LE: loop exit
PB: predicated region body
PF: predicated region fallthrough
CT: control target
= control target key end

     0   :  { %7 = vsyncpa [#allocation3], 0  ;;  %s1604_s0 = inlined_call_operand.hbm [shape: f32[300,256], index: 0, kind: input, shape index: {}]   ;;  %s1605_s1 = inlined_call_operand.vmem [shape: f32[256,16], index: 1, kind: input, shape index: {}]   ;;  %s1606_s2 = inlined_call_operand.hbm [shape: f32[2,1,128], index: 2, kind: output, shape index: {}]  }
   0x1   :  { %9 = vsyncpa [#allocation3 + $0x1], 0 }
   0x2   :  { %10 = vsyncpa [#allocation4], 0 }
   0x3   :  { %12 = vsyncpa [#allocation4 + $0x1], 0  ;;  %s1250_s9 = smov 0   ;;  %s1252_s10 = smov 0  }
   0x4   :  { %s1254_s11 = smov 0   ;;  %s1256_s12 = smov 0  }
   0x5 LB: > { %s1271_s13 = sadd.s32 4294967295, %s1227_s12   ;;  %s881_s14 = sadd.s32 4294967294, %s1227_s12   ;;  %s1227_s12 = sphi %s1256_s12, %s1616_s12   ;;  %s1223_s11 = sphi %s1254_s11, %s1615_s11   ;;  %s1219_s10 = sphi %s1252_s10, %s1614_s10   ;;  %s1215_s9 = sphi %s1250_s9, %s1613_s9  }
   0x6   : > { %s1275_s15 = sadd.s32 1, %s1227_s12   ;;  %s25_s16 = sadd.s32 1, %s1223_s11 }
   0x7   : > { %s22_s17 = ssub.s32 %s1227_s12, %s1275_s15  ;;  %p32_p0 = scmp.ne.s32.totalorder %s1223_s11, %s1219_s10 }
   0x8   : > { %p23_p1 = scmp.eq.s32.totalorder %s22_s17, 0  ;;  %p33_p2 = scmp.eq.s32.totalorder %s1227_s12, 0 }
   0x9   : > { %p38_p3 = scmp.ne.s32.totalorder %s1219_s10, %s1215_s9  ;;  %p39_p4 = scmp.eq.s32.totalorder %s1271_s13, 0 }
   0xa   : > { %s1287_s18 = scalar_select %p23_p1, %s1223_s11, %s25_s16  }
   0xb   : > { %p34_p5 = por %p33_p2, %p32_p0  ;;  %p1289_p6 = por %p39_p4, %p38_p3 }
   0xc   : > { %p83_p7 = scmp.eq.s32.totalorder %s1271_s13, 1  ;;  %p89_p8 = scmp.eq.s32.totalorder %s881_s14, 1 }
   0xd   : > { %p1607_p11 = scmp.ge.s32.totalorder %s1227_s12, 2 }
   0xe   : > { %p1294_p9 = por %p83_p7, %p32_p0  ;;  %p1298_p10 = por %p89_p8, %p38_p3 }
   0xf   : > { %108 = sbr.rel (%p1607_p11) target bundleno = 52 (0x34), region = 20 }
  0x10   : > { %s1610_s21 = scalar_select %p1298_p10, 1, 0 }
  0x14   : > { %111 = sbr.rel (!%p34_p5) target bundleno = 52 (0x34), region = 24  ;;  %s112_s22 = sand.u32 (%p34_p5), 1, %s1223_s11  }
  0x15   : > { %s885_s23 = sshll.u32 (%p34_p5), %s1227_s12, 4  ;;  %s884_s24 = sshll.u32 (%p34_p5), %s112_s22, 8 }
  0x16   : > { %s118_s25 = ssub.s32 (%p34_p5), 38, %s885_s23  ;;  %s1310_s28 = scalar_lea.sflag (%p34_p5), [#allocation3], %s112_s22 }
  0x17   : > { %p119_p12 = scmp.lt.s32.totalorder (%p34_p5), %s118_s25, 16  ;;  %s116_s29 = scalar_lea.vmem (%p34_p5), [#allocation2], %s884_s24 }
  0x19   : > { %s1618_s25 = smov (!%p119_p12, %s118_s25), 16 }
  0x1a   : > { %s1307_s26 = sshll.u32 %s1618_s25, 8 }
  0x1b   : > { %s124_s27 = ssub.s32 4096, %s1307_s26 }
  0x1c   : > { %125 = vsyncadd %s1310_s28, %s124_s27  ;;  %p888_p13 = scmp.ne.s32.totalorder %s1307_s26, 0  ;;  %s916_s30 = sshll.u32 %s1227_s12, 12 }
  0x1d   : > { %s1318_s5 = scalar_lea.hbm %s1604_s0, %s916_s30  ;;  %s131_s6 = sshll.u32 %s116_s29, 4  ;;  %s1320_s6 = int_to_ptr.vmem [resolvable:$true] %s131_s6 }
  0x1e   : > { %s1137_s7 = scalar_lea.hbm %s1318_s5, %s1307_s26  ;;  %s1141_s16 = scalar_lea.hbm %s1604_s0, 9728 }
  0x1f   : > { %p1138_p0 = scmp.ne.s32.totalorder %s1318_s5, %s1137_s7  ;;  %p1142_p3 = scmp.lt.s32.totalorder %s1318_s5, %s1604_s0 }
  0x20   : > { %p1143_p4 = scmp.lt.s32.totalorder %s1141_s16, %s1137_s7 }
  0x21   : > { %p1139_p1 = pnand %p1138_p0, %p888_p13 }
  0x22   : > { %p1144_p5 = por %p1143_p4, %p1142_p3 }
  0x23   : > { %p1140_p2 = pneg %p1139_p1 }
  0x25   : > { %p1145_p7 = pnand %p1144_p5, %p1140_p2 }
  0x27   : > { %1148 = shalt.err (!%p1145_p7)
}
  0x28   : > { %s1149_s23 = scalar_lea.vmem %s1320_s6, %s1307_s26  ;;  %s1229_s24 = smov [#allocation2]  }
  0x29   : > { %p1150_p8 = scmp.ne.s32.totalorder %s1320_s6, %s1149_s23  ;;  %s1153_s25 = sshll.u32 %s1229_s24, 4  ;;  %s1154_s25 = int_to_ptr.vmem [resolvable:$false] %s1153_s25 }
  0x2a   : > { %s1155_s27 = scalar_lea.vmem %s1154_s25, 8192  ;;  %p1156_p1 = scmp.lt.s32.totalorder %s1320_s6, %s1154_s25 }
  0x2b   : > { %p1151_p12 = pnand %p1150_p8, %p888_p13  ;;  %p1157_p11 = scmp.lt.s32.totalorder %s1155_s27, %s1149_s23 }
  0x2d   : > { %p1152_p0 = pneg %p1151_p12  ;;  %p1158_p10 = por %p1157_p11, %p1156_p1 }
  0x2f   : > { %p1159_p3 = pnand %p1158_p10, %p1152_p0 }
  0x31   : > { %1162 = shalt.err (!%p1159_p3)
}
  0x32   : > { %s1230_s29 = smov 256   ;;  %s1231_s30 = smov 16  }
  0x33   : > { %137 = dma.hbm_to_vmem [thread:$0]  (%p888_p13), %s1318_s5, %s1307_s26, %s1320_s6, %s1310_s28, %s1230_s29, %s1230_s29, %s1231_s30  }
  0x34 PF: > { %p893_p2 = scmp.ge.s32.totalorder %s1227_s12, 1  ;;  %p139_p4 = scmp.lt.s32.totalorder %s1227_s12, 3 }
  0x36   : > { %p140_p5 = pnand %p893_p2, %p139_p4 }
  0x37   : > { %s1349_s3 = sand.u32 (!%p140_p5), 1, %s1219_s10  }
  0x38   : > { %143 = sbr.rel (%p140_p5) target bundleno = 720 (0x2d0), region = 28  ;;  %s894_s4 = sshll.u32 (!%p140_p5), %s1349_s3, 8 }
  0x39   : > { %s146_s7 = scalar_lea.sflag (!%p140_p5), [#allocation3], %s1349_s3  ;;  %s1353_s8 = scalar_lea.vmem (!%p140_p5), [#allocation2], %s894_s4 }
  0x3d   : > { %1206 = dma.done.wait (%p1289_p6), %s146_s7, 4096  }
  0x3e   : > { %1208 = vsyncadd (%p1289_p6), %s146_s7, 4294963200  ;;  %v238_v0 = vld [vmem:[%s1605_s1 + $0xf8] sm:$0xff]  ;;  %v237_v2 = vld [vmem:[%s1605_s1 + $0xf0] sm:$0xff]  ;;  %s1232_s29 = smov 8   ;;  %vm624_vm0 = vcmask 64512   ;;  %vm700_vm1 = vcmask 130112  }
  0x3f   : > { %v222_v1 = vld [vmem:[%s1605_s1 + $0x78] sm:$0xff]  ;;  %917 = vmatprep.subr.mxu0 %v238_v0  ;;  %997 = vmatprep.subr.mxu1 %v238_v0  ;;  %v221_v3 = vld [vmem:[%s1605_s1 + $0x70] sm:$0xff]  ;;  %v236_v4 = vld [vmem:[%s1605_s1 + $0xe8] sm:$0xff]  ;;  %vm707_vm2 = vcmask 195712   ;;  %vm714_vm3 = vcmask 261312   ;;  %vm721_vm4 = vcmask 326912  }
  0x40   : > { %918 = vmatpush3.msra.mxu0 %v222_v1  ;;  %1013 = vmatpush3.msra.mxu1 %v222_v1  ;;  %v220_v5 = vld [vmem:[%s1605_s1 + $0x68] sm:$0xff]  ;;  %v235_v6 = vld [vmem:[%s1605_s1 + $0xe0] sm:$0xff]  ;;  %v234_v8 = vld [vmem:[%s1605_s1 + $0xd8] sm:$0xff]  ;;  %vm728_vm5 = vcmask 392512   ;;  %vm735_vm6 = vcmask 458112   ;;  %vm742_vm7 = vcmask 523712  }
  0x41   : > { %919 = vmatprep.subr.mxu0 %v237_v2  ;;  %998 = vmatprep.subr.mxu1 %v237_v2  ;;  %v219_v7 = vld [vmem:[%s1605_s1 + $0x60] sm:$0xff]  ;;  %v218_v9 = vld [vmem:[%s1605_s1 + $0x58] sm:$0xff]  ;;  %v233_v10 = vld [vmem:[%s1605_s1 + $0xd0] sm:$0xff]  ;;  %vm749_vm8 = vcmask 589312   ;;  %vm756_vm9 = vcmask 654912   ;;  %vm763_vm10 = vcmask 720512  }
  0x42   : > { %920 = vmatpush3.msra.mxu0 %v221_v3  ;;  %1014 = vmatpush3.msra.mxu1 %v221_v3  ;;  %v217_v11 = vld [vmem:[%s1605_s1 + $0x50] sm:$0xff]  ;;  %v232_v12 = vld [vmem:[%s1605_s1 + $0xc8] sm:$0xff]  ;;  %v231_v14 = vld [vmem:[%s1605_s1 + $0xc0] sm:$0xff]  ;;  %vm770_vm11 = vcmask 786112   ;;  %vm777_vm12 = vcmask 851712   ;;  %vm784_vm13 = vcmask 917312  }
  0x43   : > { %921 = vmatprep.subr.mxu0 %v236_v4  ;;  %999 = vmatprep.subr.mxu1 %v236_v4  ;;  %v216_v13 = vld [vmem:[%s1605_s1 + $0x48] sm:$0xff]  ;;  %v215_v15 = vld [vmem:[%s1605_s1 + $0x40] sm:$0xff]  ;;  %v230_v16 = vld [vmem:[%s1605_s1 + $0xb8] sm:$0xff]  ;;  %vm791_vm14 = vcmask 982912   ;;  %s911_s30 = sshll.u32 %s1271_s13, 4  ;;  %s168_s4 = scalar_lea.vmem [#allocation5], %s1349_s3 }
  0x44   : > { %922 = vmatpush3.msra.mxu0 %v220_v5  ;;  %1015 = vmatpush3.msra.mxu1 %v220_v5  ;;  %v214_v17 = vld [vmem:[%s1605_s1 + $0x38] sm:$0xff]  ;;  %v229_v18 = vld [vmem:[%s1605_s1 + $0xb0] sm:$0xff]  ;;  %v228_v20 = vld [vmem:[%s1605_s1 + $0xa8] sm:$0xff]  ;;  %s815_s7 = sshll.u32 %s168_s4, 4  ;;  %vm798_vm15 = vcmask 1048512   ;;  %s1567_s5 = scalar_lea.hbm %s1606_s2, %s911_s30  ;;  %s816_s7 = int_to_ptr.vmem [resolvable:$true] %s815_s7 }
  0x45   : > { %923 = vmatprep.subr.mxu0 %v235_v6  ;;  %1000 = vmatprep.subr.mxu1 %v235_v6  ;;  %v213_v19 = vld [vmem:[%s1605_s1 + $0x30] sm:$0xff]  ;;  %v212_v21 = vld [vmem:[%s1605_s1 + $0x28] sm:$0xff]  ;;  %v227_v22 = vld [vmem:[%s1605_s1 + $0xa0] sm:$0xff]  ;;  %s803_s6 = scalar_lea.sflag [#allocation4], %s1349_s3  ;;  %s1163_s13 = scalar_lea.vmem %s816_s7, 16 }
  0x46   : > { %924 = vmatpush3.msra.mxu0 %v219_v7  ;;  %1016 = vmatpush3.msra.mxu1 %v219_v7  ;;  %v211_v23 = vld [vmem:[%s1605_s1 + $0x20] sm:$0xff]  ;;  %v226_v24 = vld [vmem:[%s1605_s1 + $0x98] sm:$0xff]  ;;  %v225_v26 = vld [vmem:[%s1605_s1 + $0x90] sm:$0xff]  ;;  %p1164_p6 = scmp.ne.s32.totalorder %s816_s7, %s1163_s13  ;;  %s1234_s14 = smov [#allocation5]  }
  0x47   : > { %925 = vmatprep.subr.mxu0 %v234_v8  ;;  %1001 = vmatprep.subr.mxu1 %v234_v8  ;;  %v210_v25 = vld [vmem:[%s1605_s1 + $0x18] sm:$0xff]  ;;  %v209_v27 = vld [vmem:[%s1605_s1 + $0x10] sm:$0xff]  ;;  %v224_v28 = vld [vmem:[%s1605_s1 + $0x88] sm:$0xff]  ;;  %s1167_s16 = sshll.u32 %s1234_s14, 4  ;;  %s1168_s16 = int_to_ptr.vmem [resolvable:$false] %s1167_s16 }
  0x48   : > { %926 = vmatpush3.msra.mxu0 %v218_v9  ;;  %1017 = vmatpush3.msra.mxu1 %v218_v9  ;;  %v208_v29 = vld [vmem:[%s1605_s1 + $0x8] sm:$0xff]  ;;  %v223_v30 = vld [vmem:[%s1605_s1 + $0x80] sm:$0xff]  ;;  %v178_v36 = vld [vmem:[%s1353_s8 + $0x18] sm:$0xff]  ;;  %p1165_p10 = pnand %p1164_p6, %p1294_p9  ;;  %s1169_s17 = scalar_lea.vmem %s1168_s16, 32 }
  0x49   : > { %927 = vmatprep.subr.mxu0 %v233_v10  ;;  %1002 = vmatprep.subr.mxu1 %v233_v10  ;;  %v207_v31 = vld [vmem:[%s1605_s1] sm:$0xff]  ;;  %v176_v32 = vld [vmem:[%s1353_s8 + $0x8] sm:$0xff]  ;;  %v194_v37 = vld [vmem:[%s1353_s8 + $0x98] sm:$0xff]  ;;  %p1170_p13 = scmp.lt.s32.totalorder %s816_s7, %s1168_s16  ;;  %p1171_p7 = scmp.lt.s32.totalorder %s1169_s17, %s1163_s13 }
  0x4a   : > { %928 = vmatpush3.msra.mxu0 %v217_v11  ;;  %1018 = vmatpush3.msra.mxu1 %v217_v11  ;;  %v192_v33 = vld [vmem:[%s1353_s8 + $0x88] sm:$0xff]  ;;  %v175_v34 = vld [vmem:[%s1353_s8] sm:$0xff]  ;;  %v177_v38 = vld [vmem:[%s1353_s8 + $0x10] sm:$0xff]  ;;  %p1166_p11 = pneg %p1165_p10 }
  0x4b   : > { %929 = vmatprep.subr.mxu0 %v232_v12  ;;  %1003 = vmatprep.subr.mxu1 %v232_v12  ;;  %v191_v35 = vld [vmem:[%s1353_s8 + $0x80] sm:$0xff]  ;;  %v193_v39 = vld [vmem:[%s1353_s8 + $0x90] sm:$0xff]  ;;  %v180_v40 = vld [vmem:[%s1353_s8 + $0x28] sm:$0xff]  ;;  %p1172_p8 = por %p1171_p7, %p1170_p13 }
  0x4c   : > { %930 = vmatpush3.msra.mxu0 %v216_v13  ;;  %1019 = vmatpush3.msra.mxu1 %v216_v13  ;;  %v196_v41 = vld [vmem:[%s1353_s8 + $0xa8] sm:$0xff]  ;;  %v179_v42 = vld [vmem:[%s1353_s8 + $0x20] sm:$0xff]  ;;  %v182_v44 = vld [vmem:[%s1353_s8 + $0x38] sm:$0xff] }
  0x4d   : > { %931 = vmatprep.subr.mxu0 %v231_v14  ;;  %1004 = vmatprep.subr.mxu1 %v231_v14  ;;  %v195_v43 = vld [vmem:[%s1353_s8 + $0xa0] sm:$0xff]  ;;  %v198_v45 = vld [vmem:[%s1353_s8 + $0xb8] sm:$0xff]  ;;  %v181_v46 = vld [vmem:[%s1353_s8 + $0x30] sm:$0xff]  ;;  %p1173_p12 = pnand %p1172_p8, %p1166_p11 }
  0x4e   : > { %932 = vmatpush3.msra.mxu0 %v215_v15  ;;  %1020 = vmatpush3.msra.mxu1 %v215_v15  ;;  %v197_v47 = vld [vmem:[%s1353_s8 + $0xb0] sm:$0xff]  ;;  %v184_v48 = vld [vmem:[%s1353_s8 + $0x48] sm:$0xff]  ;;  %v183_v50 = vld [vmem:[%s1353_s8 + $0x40] sm:$0xff] }
  0x4f   : > { %933 = vmatprep.subr.mxu0 %v230_v16  ;;  %1005 = vmatprep.subr.mxu1 %v230_v16  ;;  %v200_v49 = vld [vmem:[%s1353_s8 + $0xc8] sm:$0xff]  ;;  %v199_v51 = vld [vmem:[%s1353_s8 + $0xc0] sm:$0xff]  ;;  %v186_v52 = vld [vmem:[%s1353_s8 + $0x58] sm:$0xff] }
  0x50   : > { %934 = vmatpush3.msra.mxu0 %v214_v17  ;;  %1021 = vmatpush3.msra.mxu1 %v214_v17  ;;  %v202_v53 = vld [vmem:[%s1353_s8 + $0xd8] sm:$0xff]  ;;  %v185_v54 = vld [vmem:[%s1353_s8 + $0x50] sm:$0xff]  ;;  %v188_v56 = vld [vmem:[%s1353_s8 + $0x68] sm:$0xff] }
  0x51   : > { %935 = vmatprep.subr.mxu0 %v229_v18  ;;  %1006 = vmatprep.subr.mxu1 %v229_v18  ;;  %v201_v55 = vld [vmem:[%s1353_s8 + $0xd0] sm:$0xff]  ;;  %v204_v57 = vld [vmem:[%s1353_s8 + $0xe8] sm:$0xff]  ;;  %v187_v58 = vld [vmem:[%s1353_s8 + $0x60] sm:$0xff] }
  0x52   : > { %936 = vmatpush3.msra.mxu0 %v213_v19  ;;  %1022 = vmatpush3.msra.mxu1 %v213_v19  ;;  %v203_v59 = vld [vmem:[%s1353_s8 + $0xe0] sm:$0xff]  ;;  %v190_v60 = vld [vmem:[%s1353_s8 + $0x78] sm:$0xff]  ;;  %v189_v62 = vld [vmem:[%s1353_s8 + $0x70] sm:$0xff] }
  0x53   : > { %937 = vmatprep.subr.mxu0 %v228_v20  ;;  %1007 = vmatprep.subr.mxu1 %v228_v20  ;;  %v206_v61 = vld [vmem:[%s1353_s8 + $0xf8] sm:$0xff]  ;;  %v205_v63 = vld [vmem:[%s1353_s8 + $0xf0] sm:$0xff]  ;;  %s1233_s8 = smov 120  }
  0x54   : > { %938 = vmatpush3.msra.mxu0 %v212_v21  ;;  %1023 = vmatpush3.msra.mxu1 %v212_v21 }
  0x55   : > { %939 = vmatprep.subr.mxu0 %v227_v22  ;;  %1008 = vmatprep.subr.mxu1 %v227_v22 }
  0x56   : > { %940 = vmatpush3.msra.mxu0 %v211_v23  ;;  %1024 = vmatpush3.msra.mxu1 %v211_v23 }
  0x57   : > { %941 = vmatprep.subr.mxu0 %v226_v24  ;;  %1009 = vmatprep.subr.mxu1 %v226_v24 }
  0x58   : > { %942 = vmatpush3.msra.mxu0 %v210_v25  ;;  %1025 = vmatpush3.msra.mxu1 %v210_v25 }
  0x59   : > { %943 = vmatprep.subr.mxu0 %v225_v26  ;;  %1010 = vmatprep.subr.mxu1 %v225_v26 }
  0x5a   : > { %944 = vmatpush3.msra.mxu0 %v209_v27  ;;  %1026 = vmatpush3.msra.mxu1 %v209_v27 }
  0x5b   : > { %945 = vmatprep.subr.mxu0 %v224_v28  ;;  %1011 = vmatprep.subr.mxu1 %v224_v28 }
  0x5c   : > { %946 = vmatpush3.msra.mxu0 %v208_v29  ;;  %1027 = vmatpush3.msra.mxu1 %v208_v29 }
  0x5d   : > { %947 = vmatprep.subr.mxu0 %v223_v30  ;;  %1012 = vmatprep.subr.mxu1 %v223_v30 }
  0x5e   : > { %948 = vmatpush3.msra.mxu0 %v207_v31  ;;  %1028 = vmatpush3.msra.mxu1 %v207_v31 }
  0x5f   : > { %303 = vmatprep.mubr.f32.mxu0 %v176_v32  ;;  %343 = vmatprep.mubr.f32.mxu1 %v192_v33 }
  0x60   : > { %304 = vmatmul.mubr.f32.vlgmr.msra.gmra.mxu0 %v175_v34  ;;  %344 = vmatmul.mubr.f32.vlgmr.msra.gmra.mxu1 %v191_v35 }
  0x61   : > { %308 = vmatprep.mubr.f32.mxu0 %v178_v36  ;;  %348 = vmatprep.mubr.f32.mxu1 %v194_v37 }
  0x64   : > { %309 = vmatmul.mubr.f32.gmra.mxu0 %v177_v38  ;;  %349 = vmatmul.mubr.f32.gmra.mxu1 %v193_v39 }
  0x65   : > { %313 = vmatprep.mubr.f32.mxu0 %v180_v40  ;;  %353 = vmatprep.mubr.f32.mxu1 %v196_v41 }
  0x68   : > { %314 = vmatmul.mubr.f32.gmra.mxu0 %v179_v42  ;;  %354 = vmatmul.mubr.f32.gmra.mxu1 %v195_v43 }
  0x69   : > { %318 = vmatprep.mubr.f32.mxu0 %v182_v44  ;;  %358 = vmatprep.mubr.f32.mxu1 %v198_v45 }
  0x6c   : > { %319 = vmatmul.mubr.f32.gmra.mxu0 %v181_v46  ;;  %359 = vmatmul.mubr.f32.gmra.mxu1 %v197_v47 }
  0x6d   : > { %323 = vmatprep.mubr.f32.mxu0 %v184_v48  ;;  %363 = vmatprep.mubr.f32.mxu1 %v200_v49 }
  0x70   : > { %324 = vmatmul.mubr.f32.gmra.mxu0 %v183_v50  ;;  %364 = vmatmul.mubr.f32.gmra.mxu1 %v199_v51 }
  0x71   : > { %328 = vmatprep.mubr.f32.mxu0 %v186_v52  ;;  %368 = vmatprep.mubr.f32.mxu1 %v202_v53 }
  0x74   : > { %329 = vmatmul.mubr.f32.gmra.mxu0 %v185_v54  ;;  %369 = vmatmul.mubr.f32.gmra.mxu1 %v201_v55 }
  0x75   : > { %333 = vmatprep.mubr.f32.mxu0 %v188_v56  ;;  %373 = vmatprep.mubr.f32.mxu1 %v204_v57 }
  0x78   : > { %334 = vmatmul.mubr.f32.gmra.mxu0 %v187_v58  ;;  %374 = vmatmul.mubr.f32.gmra.mxu1 %v203_v59 }
  0x79   : > { %338 = vmatprep.mubr.f32.mxu0 %v190_v60  ;;  %378 = vmatprep.mubr.f32.mxu1 %v206_v61 }
  0x7c   : > { %339 = vmatmul.mubr.f32.gmra.mxu0 %v189_v62  ;;  %379 = vmatmul.mubr.f32.gmra.mxu1 %v205_v63 }
 0x120   : > { %v949_v0 = vpop.f32.mrf.mxu0  ;;  %v973_v1 = vpop.f32.mrf.mxu1 }
 0x122   : > { %v950_v2 = vpop.f32.mrf.mxu0  ;;  %v974_v3 = vpop.f32.mrf.mxu1 }
 0x123   : > { %v951_v4 = vadd.f32 %v950_v2, %v949_v0  ;;  %v975_v9 = vadd.f32 %v974_v3, %v973_v1 }
 0x124   : > { %v952_v5 = vpop.f32.mrf.mxu0  ;;  %v976_v6 = vpop.f32.mrf.mxu1 }
 0x125   : > { %496 = vrot.lane.b32.xlu0 %v951_v4, %s1232_s29  ;;  %v895_v48 = vmul.f32 -1.442695, %v951_v4  ;;  %v903_v49 = vmul.f32 -1.442695, %v975_v9 }
 0x126   : > { %v953_v7 = vpop.f32.mrf.mxu0  ;;  %v977_v8 = vpop.f32.mrf.mxu1 }
 0x127   : > { %v978_v10 = vadd.f32 %v977_v8, %v976_v6  ;;  %v954_v15 = vadd.f32 %v953_v7, %v952_v5  ;;  %1073 = vpow2.f32 %v895_v48 }
 0x128   : > { %v955_v11 = vpop.f32.mrf.mxu0  ;;  %v979_v12 = vpop.f32.mrf.mxu1  ;;  %1075 = vpow2.f32 %v903_v49 }
 0x129   : > { %514 = vrot.lane.b32.xlu1 %v978_v10, %s1232_s29  ;;  %512 = vrot.lane.b32.xlu0 %v975_v9, %s1232_s29  ;;  %v896_v50 = vmul.f32 -1.442695, %v954_v15  ;;  %v904_v52 = vmul.f32 -1.442695, %v978_v10 }
 0x12a   : > { %v956_v13 = vpop.f32.mrf.mxu0  ;;  %v980_v14 = vpop.f32.mrf.mxu1 }
 0x12b   : > { %v957_v16 = vadd.f32 %v956_v13, %v955_v11  ;;  %v981_v19 = vadd.f32 %v980_v14, %v979_v12  ;;  %1077 = vpow2.f32 %v896_v50 }
 0x12c   : > { %v958_v17 = vpop.f32.mrf.mxu0  ;;  %v982_v18 = vpop.f32.mrf.mxu1 }
 0x12d   : > { %500 = vrot.lane.b32.xlu1 %v957_v16, %s1232_s29  ;;  %498 = vrot.lane.b32.xlu0 %v954_v15, %s1232_s29  ;;  %v897_v51 = vmul.f32 -1.442695, %v957_v16  ;;  %v905_v53 = vmul.f32 -1.442695, %v981_v19 }
 0x12e   : > { %v959_v20 = vpop.f32.mrf.mxu0  ;;  %v983_v21 = vpop.f32.mrf.mxu1 }
 0x12f   : > { %v960_v22 = vadd.f32 %v959_v20, %v958_v17  ;;  %v984_v25 = vadd.f32 %v983_v21, %v982_v18  ;;  %1079 = vpow2.f32 %v897_v51 }
 0x130   : > { %v961_v23 = vpop.f32.mrf.mxu0  ;;  %v985_v24 = vpop.f32.mrf.mxu1  ;;  %1081 = vpow2.f32 %v904_v52 }
 0x131   : > { %502 = vrot.lane.b32.xlu1 %v960_v22, %s1232_s29  ;;  %516 = vrot.lane.b32.xlu0 %v981_v19, %s1232_s29  ;;  %v898_v54 = vmul.f32 -1.442695, %v960_v22  ;;  %1083 = vpow2.f32 %v905_v53  ;;  %v906_v58 = vmul.f32 -1.442695, %v984_v25 }
 0x132   : > { %v962_v26 = vpop.f32.mrf.mxu0  ;;  %v986_v27 = vpop.f32.mrf.mxu1 }
 0x133   : > { %v963_v28 = vadd.f32 %v962_v26, %v961_v23  ;;  %v987_v42 = vadd.f32 %v986_v27, %v985_v24  ;;  %1085 = vpow2.f32 %v898_v54 }
 0x134   : > { %v964_v29 = vpop.f32.mrf.mxu0  ;;  %v988_v30 = vpop.f32.mrf.mxu1 }
 0x135   : > { %518 = vrot.lane.b32.xlu1 %v984_v25, %s1232_s29  ;;  %504 = vrot.lane.b32.xlu0 %v963_v28, %s1232_s29  ;;  %v899_v55 = vmul.f32 -1.442695, %v963_v28  ;;  %v1074_v56 = vpop.eup %1073  ;;  %v907_v1 = vmul.f32 -1.442695, %v987_v42 }
 0x136   : > { %v965_v31 = vpop.f32.mrf.mxu0  ;;  %v989_v32 = vpop.f32.mrf.mxu1  ;;  %v432_v59 = vadd.f32 1.0, %v1074_v56 }
 0x137   : > { %v966_v33 = vadd.f32 %v965_v31, %v964_v29  ;;  %v990_v46 = vadd.f32 %v989_v32, %v988_v30  ;;  %v1076_v57 = vpop.eup %1075  ;;  %1087 = vpow2.f32 %v899_v55 }
 0x138   : > { %v967_v34 = vpop.f32.mrf.mxu0  ;;  %v991_v35 = vpop.f32.mrf.mxu1  ;;  %v440_v60 = vadd.f32 1.0, %v1076_v57  ;;  %1089 = vpow2.f32 %v906_v58 }
 0x139   : > { %506 = vrot.lane.b32.xlu1 %v966_v33, %s1232_s29  ;;  %v1078_v61 = vpop.eup %1077  ;;  %v900_v62 = vmul.f32 -1.442695, %v966_v33  ;;  %1091 = vrcp.f32 %v432_v59  ;;  %v908_v8 = vmul.f32 -1.442695, %v990_v46 }
 0x13a   : > { %v968_v36 = vpop.f32.mrf.mxu0  ;;  %v992_v37 = vpop.f32.mrf.mxu1  ;;  %1093 = vrcp.f32 %v440_v60  ;;  %v433_v3 = vadd.f32 1.0, %v1078_v61 }
 0x13b   : > { %v969_v38 = vadd.f32 %v968_v36, %v967_v34  ;;  %v993_v44 = vadd.f32 %v992_v37, %v991_v35  ;;  %1095 = vpow2.f32 %v900_v62 }
 0x13c   : > { %v970_v39 = vpop.f32.mrf.mxu0  ;;  %v994_v41 = vpop.f32.mrf.mxu1 }
 0x13d   : > { %508 = vrot.lane.b32.xlu0 %v969_v38, %s1232_s29  ;;  %v1080_v63 = vpop.eup %1079  ;;  %v901_v0 = vmul.f32 -1.442695, %v969_v38  ;;  %v909_v11 = vmul.f32 -1.442695, %v993_v44 }
 0x13e   : > { %v971_v40 = vpop.f32.mrf.mxu0  ;;  %v995_v45 = vpop.f32.mrf.mxu1  ;;  %v434_v4 = vadd.f32 1.0, %v1080_v63 }
 0x13f   : > { %v972_v43 = vadd.f32 %v971_v40, %v970_v39  ;;  %v996_v47 = vadd.f32 %v995_v45, %v994_v41  ;;  %v1082_v2 = vpop.eup %1081  ;;  %1097 = vpow2.f32 %v901_v0 }
 0x140   : > { %v1084_v5 = vpop.eup %1083  ;;  %v441_v7 = vadd.f32 1.0, %v1082_v2  ;;  %1099 = vpow2.f32 %v907_v1 }
 0x141   : > { %510 = vrot.lane.b32.xlu1 %v972_v43, %s1232_s29  ;;  %520 = vrot.lane.b32.xlu0 %v987_v42, %s1232_s29  ;;  %v902_v6 = vmul.f32 -1.442695, %v972_v43  ;;  %1101 = vrcp.f32 %v433_v3  ;;  %v1086_v9 = vpop.eup %1085  ;;  %v442_v10 = vadd.f32 1.0, %v1084_v5  ;;  %v910_v14 = vmul.f32 -1.442695, %v996_v47 }
 0x142   : > { %1103 = vrcp.f32 %v434_v4  ;;  %v435_v13 = vadd.f32 1.0, %v1086_v9 }
 0x143   : > { %1105 = vpow2.f32 %v902_v6 }
 0x144   : > { %v1088_v12 = vpop.eup %1087  ;;  %1107 = vrcp.f32 %v441_v7 }
 0x145   : > { %522 = vrot.lane.b32.xlu1 %v990_v46, %s1232_s29  ;;  %524 = vrot.lane.b32.xlu0 %v993_v44, %s1232_s29  ;;  %1109 = vpow2.f32 %v908_v8  ;;  %v1090_v15 = vpop.eup %1089  ;;  %v436_v16 = vadd.f32 1.0, %v1088_v12 }
 0x146   : > { %1111 = vrcp.f32 %v442_v10  ;;  %v1092_v17 = vpop.eup %1091  ;;  %v443_v22 = vadd.f32 1.0, %v1090_v15 }
 0x147   : > { %1113 = vpow2.f32 %v909_v11  ;;  %v1094_v20 = vpop.eup %1093 }
 0x148   : > { %1115 = vrcp.f32 %v435_v13  ;;  %v1096_v21 = vpop.eup %1095 }
 0x149   : > { %526 = vrot.lane.b32.xlu1 %v996_v47, %s1232_s29  ;;  %1117 = vpow2.f32 %v910_v14  ;;  %v437_v29 = vadd.f32 1.0, %v1096_v21 }
 0x14a   : > { %1119 = vrcp.f32 %v436_v16 }
 0x14b   : > { %1121 = vrcp.f32 %v443_v22 }
 0x14c   : > { %v1098_v23 = vpop.eup %1097  ;;  %1123 = vrcp.f32 %v437_v29 }
 0x14d   : > { %v1100_v26 = vpop.eup %1099  ;;  %v438_v31 = vadd.f32 1.0, %v1098_v23 }
 0x14e   : > { %v1102_v28 = vpop.eup %1101  ;;  %v444_v39 = vadd.f32 1.0, %v1100_v26 }
 0x14f   : > { %v1104_v30 = vpop.eup %1103  ;;  %1125 = vrcp.f32 %v438_v31 }
 0x150   : > { %v1106_v32 = vpop.eup %1105  ;;  %1127 = vrcp.f32 %v444_v39 }
 0x151   : > { %v1108_v35 = vpop.eup %1107  ;;  %v439_v41 = vadd.f32 1.0, %v1106_v32 }
 0x152   : > { %v1110_v38 = vpop.eup %1109 }
 0x153   : > { %v1112_v40 = vpop.eup %1111  ;;  %v445_v48 = vadd.f32 1.0, %v1110_v38  ;;  %1129 = vrcp.f32 %v439_v41 }
 0x154   : > { %v1114_v42 = vpop.eup %1113 }
 0x155   : > { %v1116_v47 = vpop.eup %1115  ;;  %v446_v50 = vadd.f32 1.0, %v1114_v42  ;;  %1131 = vrcp.f32 %v445_v48 }
 0x156   : > { %v1118_v49 = vpop.eup %1117 }
 0x157   : > { %v1120_v51 = vpop.eup %1119  ;;  %1133 = vrcp.f32 %v446_v50  ;;  %v447_v56 = vadd.f32 1.0, %v1118_v49  ;;  %v689_v49 = vlaneseq }
 0x158   : > { %v1122_v57 = vpop.eup %1121 }
 0x159   : > { %v1124_v60 = vpop.eup %1123  ;;  %1135 = vrcp.f32 %v447_v56  ;;  %v1539_v56 = vshrl.u32 %v689_v49, 7 }
 0x15c   : > { %v1126_v61 = vpop.eup %1125 }
 0x15d   : > { %v1128_v1 = vpop.eup %1127 }
 0x160   : > { %v1130_v2 = vpop.eup %1129 }
 0x162   : > { %v1132_v7 = vpop.eup %1131 }
 0x164   : > { %v1134_v8 = vpop.eup %1133 }
 0x166   : > { %v1136_v13 = vpop.eup %1135 }
 0x197   : > { %v497_v18 = vpop.permute.xlu0 %496 }
 0x198   : > { %v544_v19 = vmul.f32 %v1092_v17, %v497_v18 }
 0x19a   : > { %576 = vrot.lane.b32.xlu0 %v544_v19, %s1233_s8 }
 0x19b   : > { %v515_v24 = vpop.permute.xlu1 %514  ;;  %v513_v25 = vpop.permute.xlu0 %512 }
 0x19c   : > { %v552_v27 = vmul.f32 %v1094_v20, %v513_v25  ;;  %v553_v45 = vmul.f32 %v1108_v35, %v515_v24 }
 0x19e   : > { %592 = vrot.lane.b32.xlu0 %v552_v27, %s1233_s8 }
 0x19f   : > { %v501_v33 = vpop.permute.xlu1 %500  ;;  %v499_v34 = vpop.permute.xlu0 %498 }
 0x1a0   : > { %v546_v36 = vmul.f32 %v1104_v30, %v501_v33  ;;  %v545_v37 = vmul.f32 %v1102_v28, %v499_v34 }
 0x1a2   : > { %578 = vrot.lane.b32.xlu1 %v545_v37, %s1233_s8  ;;  %580 = vrot.lane.b32.xlu0 %v546_v36, %s1233_s8 }
 0x1a3   : > { %v503_v43 = vpop.permute.xlu1 %502  ;;  %v517_v44 = vpop.permute.xlu0 %516 }
 0x1a4   : > { %v554_v46 = vmul.f32 %v1112_v40, %v517_v44  ;;  %v547_v54 = vmul.f32 %v1116_v47, %v503_v43 }
 0x1a6   : > { %594 = vrot.lane.b32.xlu1 %v553_v45, %s1233_s8  ;;  %596 = vrot.lane.b32.xlu0 %v554_v46, %s1233_s8 }
 0x1a7   : > { %v519_v52 = vpop.permute.xlu1 %518  ;;  %v505_v53 = vpop.permute.xlu0 %504 }
 0x1a8   : > { %v548_v55 = vmul.f32 %v1120_v51, %v505_v53  ;;  %v555_v58 = vmul.f32 %v1122_v57, %v519_v52  ;;  %v690_v52 = vand.u32 127, %v689_v49 }
 0x1aa   : > { %582 = vrot.lane.b32.xlu1 %v547_v54, %s1233_s8  ;;  %584 = vrot.lane.b32.xlu0 %v548_v55, %s1233_s8  ;;  %v695_v54 = vadd.s32 4294967288, %v690_v52  ;;  %v702_v55 = vadd.s32 4294967280, %v690_v52 }
 0x1ab   : > { %v507_v59 = vpop.permute.xlu1 %506 }
 0x1ac   : > { %v549_v63 = vmul.f32 %v1124_v60, %v507_v59  ;;  %v698_v60 = vsub.s32 %v695_v54, %v1539_v56 }
 0x1ae   : > { %598 = vrot.lane.b32.xlu1 %v555_v58, %s1233_s8  ;;  %v709_v58 = vadd.s32 4294967272, %v690_v52 }
 0x1af   : > { %v509_v62 = vpop.permute.xlu0 %508 }
 0x1b0   : > { %v550_v0 = vmul.f32 %v1126_v61, %v509_v62  ;;  %v705_v61 = vsub.s32 %v702_v55, %v1539_v56  ;;  %v693_v62 = vsub.s32 %v690_v52, %v1539_v56 }
 0x1b2   : > { %586 = vrot.lane.b32.xlu1 %v549_v63, %s1233_s8  ;;  %588 = vrot.lane.b32.xlu0 %v550_v0, %s1233_s8  ;;  %v712_v63 = vsub.s32 %v709_v58, %v1539_v56  ;;  %v716_v0 = vadd.s32 4294967264, %v690_v52 }
 0x1b3   : > { %v511_v3 = vpop.permute.xlu1 %510  ;;  %v521_v4 = vpop.permute.xlu0 %520 }
 0x1b4   : > { %v551_v5 = vmul.f32 %v1130_v2, %v511_v3  ;;  %v556_v6 = vmul.f32 %v1128_v1, %v521_v4  ;;  %v723_v4 = vadd.s32 4294967256, %v690_v52 }
 0x1b6   : > { %590 = vrot.lane.b32.xlu1 %v551_v5, %s1233_s8  ;;  %600 = vrot.lane.b32.xlu0 %v556_v6, %s1233_s8 }
 0x1b7   : > { %v523_v9 = vpop.permute.xlu1 %522  ;;  %v525_v10 = vpop.permute.xlu0 %524 }
 0x1b8   : > { %v557_v11 = vmul.f32 %v1132_v7, %v523_v9  ;;  %v558_v12 = vmul.f32 %v1134_v8, %v525_v10  ;;  %v719_v8 = vsub.s32 %v716_v0, %v1539_v56  ;;  %v730_v9 = vadd.s32 4294967248, %v690_v52 }
 0x1ba   : > { %602 = vrot.lane.b32.xlu1 %v557_v11, %s1233_s8  ;;  %604 = vrot.lane.b32.xlu0 %v558_v12, %s1233_s8 }
 0x1bb   : > { %v527_v14 = vpop.permute.xlu1 %526 }
 0x1bc   : > { %v559_v15 = vmul.f32 %v1136_v13, %v527_v14  ;;  %v726_v13 = vsub.s32 %v723_v4, %v1539_v56  ;;  %v737_v14 = vadd.s32 4294967240, %v690_v52 }
 0x1be   : > { %606 = vrot.lane.b32.xlu1 %v559_v15, %s1233_s8  ;;  %v744_v15 = vadd.s32 4294967232, %v690_v52 }
 0x20c   : > { %v577_v16 = vpop.permute.xlu0 %576 }
 0x20d   : > { %v625_v17 = vsel %vm624_vm0, %v577_v16, 0.0 }
 0x20e   : > { %626 = vadd.xlane.f32.xlu0 %v625_v17  ;;  %v751_v17 = vadd.s32 4294967224, %v690_v52 }
 0x210   : > { %v593_v18 = vpop.permute.xlu0 %592 }
 0x211   : > { %v649_v19 = vsel %vm624_vm0, %v593_v18, 0.0 }
 0x212   : > { %650 = vadd.xlane.f32.xlu1 %v649_v19  ;;  %v758_v19 = vadd.s32 4294967216, %v690_v52 }
 0x214   : > { %v579_v20 = vpop.permute.xlu1 %578  ;;  %v581_v21 = vpop.permute.xlu0 %580 }
 0x215   : > { %v628_v22 = vsel %vm624_vm0, %v579_v20, 0.0  ;;  %v631_v29 = vsel %vm624_vm0, %v581_v21, 0.0  ;;  %v733_v21 = vsub.s32 %v730_v9, %v1539_v56 }
 0x216   : > { %629 = vadd.xlane.f32.xlu1 %v628_v22 }
 0x218   : > { %v595_v23 = vpop.permute.xlu1 %594  ;;  %v597_v24 = vpop.permute.xlu0 %596 }
 0x219   : > { %v652_v25 = vsel %vm624_vm0, %v595_v23, 0.0  ;;  %v655_v26 = vsel %vm624_vm0, %v597_v24, 0.0  ;;  %v765_v23 = vadd.s32 4294967208, %v690_v52 }
 0x21a   : > { %653 = vadd.xlane.f32.xlu0 %v652_v25  ;;  %656 = vadd.xlane.f32.xlu1 %v655_v26  ;;  %v740_v25 = vsub.s32 %v737_v14, %v1539_v56  ;;  %v747_v26 = vsub.s32 %v744_v15, %v1539_v56 }
 0x21c   : > { %v583_v27 = vpop.permute.xlu1 %582  ;;  %v585_v28 = vpop.permute.xlu0 %584 }
 0x21d   : > { %v637_v30 = vsel %vm624_vm0, %v585_v28, 0.0  ;;  %v634_v32 = vsel %vm624_vm0, %v583_v27, 0.0  ;;  %v772_v27 = vadd.s32 4294967200, %v690_v52 }
 0x21e   : > { %632 = vadd.xlane.f32.xlu0 %v631_v29  ;;  %638 = vadd.xlane.f32.xlu1 %v637_v30  ;;  %v754_v29 = vsub.s32 %v751_v17, %v1539_v56 }
 0x220   : > { %v599_v31 = vpop.permute.xlu1 %598 }
 0x221   : > { %v658_v35 = vsel %vm624_vm0, %v599_v31, 0.0 }
 0x222   : > { %635 = vadd.xlane.f32.xlu0 %v634_v32  ;;  %v779_v32 = vadd.s32 4294967192, %v690_v52 }
 0x224   : > { %v587_v33 = vpop.permute.xlu1 %586  ;;  %v589_v34 = vpop.permute.xlu0 %588 }
 0x225   : > { %v643_v36 = vsel %vm624_vm0, %v589_v34, 0.0  ;;  %v640_v39 = vsel %vm624_vm0, %v587_v33, 0.0  ;;  %v761_v33 = vsub.s32 %v758_v19, %v1539_v56 }
 0x226   : > { %659 = vadd.xlane.f32.xlu0 %v658_v35  ;;  %644 = vadd.xlane.f32.xlu1 %v643_v36  ;;  %v786_v35 = vadd.s32 4294967184, %v690_v52 }
 0x228   : > { %v591_v37 = vpop.permute.xlu1 %590  ;;  %v601_v38 = vpop.permute.xlu0 %600 }
 0x229   : > { %v661_v40 = vsel %vm624_vm0, %v601_v38, 0.0  ;;  %v646_v43 = vsel %vm624_vm0, %v591_v37, 0.0  ;;  %v768_v37 = vsub.s32 %v765_v23, %v1539_v56 }
 0x22a   : > { %641 = vadd.xlane.f32.xlu0 %v640_v39  ;;  %662 = vadd.xlane.f32.xlu1 %v661_v40  ;;  %v793_v39 = vadd.s32 4294967176, %v690_v52 }
 0x22c   : > { %v603_v41 = vpop.permute.xlu1 %602  ;;  %v605_v42 = vpop.permute.xlu0 %604  ;;  %v796_v54 = vsub.s32 %v793_v39, %v1539_v56 }
 0x22d   : > { %v667_v44 = vsel %vm624_vm0, %v605_v42, 0.0  ;;  %v664_v45 = vsel %vm624_vm0, %v603_v41, 0.0  ;;  %v775_v41 = vsub.s32 %v772_v27, %v1539_v56 }
 0x22e   : > { %647 = vadd.xlane.f32.xlu0 %v646_v43  ;;  %668 = vadd.xlane.f32.xlu1 %v667_v44 }
 0x230   : > { %v607_v46 = vpop.permute.xlu1 %606 }
 0x231   : > { %v670_v47 = vsel %vm624_vm0, %v607_v46, 0.0 }
 0x232   : > { %665 = vadd.xlane.f32.xlu0 %v664_v45  ;;  %v782_v45 = vsub.s32 %v779_v32, %v1539_v56 }
 0x236   : > { %671 = vadd.xlane.f32.xlu0 %v670_v47  ;;  %v789_v47 = vsub.s32 %v786_v35, %v1539_v56 }
 0x297   : > { %v627_v50 = vpop.xlane.xlu0 %626 }
 0x298   : > { %v694_v6 = vrot.slane %v627_v50, %v693_v62 }
 0x29b   : > { %v1535_v48 = vpop.xlane.xlu1 %650 }
 0x29c   : > { %v748_v40 = vrot.slane %v1535_v48, %v747_v26 }
 0x29f   : > { %v630_v51 = vpop.xlane.xlu1 %629 }
 0x2a0   : > { %v699_v2 = vrot.slane %v630_v51, %v698_v60 }
 0x2a2   : > { %v701_v11 = vsel %vm700_vm1, %v699_v2, %v694_v6 }
 0x2a3   : > { %v1537_v53 = vpop.xlane.xlu0 %653  ;;  %v1541_v57 = vpop.xlane.xlu1 %656 }
 0x2a4   : > { %v755_v43 = vrot.slane %v1537_v53, %v754_v29  ;;  %v762_v46 = vrot.slane %v1541_v57, %v761_v33 }
 0x2a7   : > { %v633_v59 = vpop.xlane.xlu0 %632  ;;  %v639_v3 = vpop.xlane.xlu1 %638 }
 0x2a8   : > { %v706_v5 = vrot.slane %v633_v59, %v705_v61  ;;  %v720_v20 = vrot.slane %v639_v3, %v719_v8 }
 0x2aa   : > { %v708_v16 = vsel %vm707_vm2, %v706_v5, %v701_v11 }
 0x2ab   : > { %v636_v1 = vpop.xlane.xlu0 %635 }
 0x2ac   : > { %v713_v7 = vrot.slane %v636_v1, %v712_v63 }
 0x2ae   : > { %v715_v18 = vsel %vm714_vm3, %v713_v7, %v708_v16 }
 0x2af   : > { %v660_v10 = vpop.xlane.xlu0 %659  ;;  %v645_v12 = vpop.xlane.xlu1 %644  ;;  %v722_v28 = vsel %vm721_vm4, %v720_v20, %v715_v18 }
 0x2b0   : > { %v734_v34 = vrot.slane %v645_v12, %v733_v21  ;;  %v769_v48 = vrot.slane %v660_v10, %v768_v37 }
 0x2b3   : > { %v642_v22 = vpop.xlane.xlu0 %641  ;;  %v663_v30 = vpop.xlane.xlu1 %662 }
 0x2b4   : > { %v727_v24 = vrot.slane %v642_v22, %v726_v13  ;;  %v776_v53 = vrot.slane %v663_v30, %v775_v41 }
 0x2b6   : > { %v729_v31 = vsel %vm728_vm5, %v727_v24, %v722_v28 }
 0x2b7   : > { %v648_v36 = vpop.xlane.xlu0 %647  ;;  %v736_v42 = vsel %vm735_vm6, %v734_v34, %v729_v31  ;;  %v669_v51 = vpop.xlane.xlu1 %668 }
 0x2b8   : > { %v741_v38 = vrot.slane %v648_v36, %v740_v25  ;;  %v790_v57 = vrot.slane %v669_v51, %v789_v47 }
 0x2ba   : > { %v743_v44 = vsel %vm742_vm7, %v741_v38, %v736_v42 }
 0x2bb   : > { %v750_v49 = vsel %vm749_vm8, %v748_v40, %v743_v44  ;;  %v666_v50 = vpop.xlane.xlu0 %665 }
 0x2bc   : > { %v757_v52 = vsel %vm756_vm9, %v755_v43, %v750_v49  ;;  %v783_v59 = vrot.slane %v666_v50, %v782_v45 }
 0x2bd   : > { %v764_v55 = vsel %vm763_vm10, %v762_v46, %v757_v52 }
 0x2be   : > { %v771_v58 = vsel %vm770_vm11, %v769_v48, %v764_v55 }
 0x2bf   : > { %v778_v60 = vsel %vm777_vm12, %v776_v53, %v771_v58  ;;  %v672_v61 = vpop.xlane.xlu0 %671 }
 0x2c0   : > { %v785_v62 = vsel %vm784_vm13, %v783_v59, %v778_v60  ;;  %v797_v63 = vrot.slane %v672_v61, %v796_v54 }
 0x2c1   : > { %v792_v0 = vsel %vm791_vm14, %v790_v57, %v785_v62 }
 0x2c2   : > { %v799_v56 = vsel %vm798_vm15, %v797_v63, %v792_v0 }
 0x2c3   : > { %801 = vst [vmem:[%s168_s4] sm:$0x1] %v799_v56 }
 0x2c4   : > { %1176 = shalt.err (!%p1173_p12)
}
 0x2c5   : > { %s1177_s22 = scalar_lea.hbm %s1567_s5, 16  ;;  %s1181_s23 = scalar_lea.hbm %s1606_s2, 32 }
 0x2c6   : > { %p1178_p0 = scmp.ne.s32.totalorder %s1567_s5, %s1177_s22  ;;  %p1182_p2 = scmp.lt.s32.totalorder %s1567_s5, %s1606_s2 }
 0x2c7   : > { %p1183_p4 = scmp.lt.s32.totalorder %s1181_s23, %s1177_s22 }
 0x2c8   : > { %p1179_p1 = pnand %p1178_p0, %p1294_p9 }
 0x2c9   : > { %p1184_p5 = por %p1183_p4, %p1182_p2 }
 0x2ca   : > { %p1180_p3 = pneg %p1179_p1 }
 0x2cc   : > { %p1185_p6 = pnand %p1184_p5, %p1180_p3 }
 0x2ce   : > { %1188 = shalt.err (!%p1185_p6)
}
 0x2cf   : > { %1030 = dma.vmem_to_hbm [thread:$0]  (%p1294_p9), %s816_s7, 16, %s1567_s5, %s803_s6  }
 0x2d0 PF: > { %s827_s27 = sand.u32 1, %s1215_s9   ;;  %p1611_p10 = scmp.ne.s32.totalorder %s1610_s21, 0 }
 0x2d1   : > { %p1612_p11 = scmp.ge.s32.totalorder %s1227_s12, 2  ;;  %s828_s29 = scalar_lea.sflag [#allocation4], %s827_s27 }
 0x2d3   : > { %p1033_p13 = pnand %p1612_p11, %p1611_p10 }
 0x2d5   : > { %p1034_p7 = pneg %p1033_p13 }
 0x2d7   : > { %1210 = dma.done.wait (%p1034_p7), %s828_s29, 16  }
 0x2d8   : > { %1212 = vsyncadd (%p1034_p7), %s828_s29, 4294967280  ;;  %p15_p8 = scmp.ge.s32.totalorder %s1275_s15, 4   ;;  %s1613_s9 = smov %s1219_s10 }
 0x2d9   : > { %s1614_s10 = smov %s1223_s11  ;;  %s1615_s11 = smov %s1287_s18 }
 0x2da   : > { %s1616_s12 = smov %s1275_s15  ;;  %17 = sbr.rel (!%p15_p8) target bundleno = 5 (0x5), region = 73 }
 0x2df   :  { %832 = vsyncpa [#allocation3], 1 }
 0x2e0   :  { %834 = vsyncpa [#allocation3 + $0x1], 1 }
 0x2e1   :  { %835 = vsyncpa [#allocation4], 1 }
 0x2e2   :  { %837 = vsyncpa [#allocation4 + $0x1], 1 }

</bundles_post_ra>
